<compile_context>
chip_gen: v7x
topology: tpu7x:2x2x1
jax: 0.10.0
libtpu: 0.0.40
codegen_flags: <defaults>
</compile_context>

<pallas_src>
import functools

import jax
import jax.numpy as jnp
from jax.experimental import pallas as pl
from jax.experimental.pallas import tpu as pltpu


def _round_up(n, m):
    return ((n + m - 1) // m) * m


def beta_vae_kernel(
    x_ref, eps_ref,
    w1_ref, w2_ref, wh_ref,            # encoder + fused (mu||logvar) head
    wd1_ref, wd2_ref, wd3_ref,         # decoder
    b_ref,                             # packed biases: [b1|b2|bmu|blv|bd1|bd2|bd3]
    out_ref,                           # packed output: [recon|mu|logvar]
    *, in_dim, latent_dim, h1, h2,
):
    f32 = jnp.float32
    bf16 = jnp.bfloat16
    L = latent_dim

    # Static offsets into the packed bias slab.
    o0 = 0
    o1 = o0 + h1            # b1   (h1)
    o2 = o1 + h2            # b2   (h2)
    o3 = o2 + 2 * L         # bmu||blv (2L)
    o4 = o3 + h2            # bd1  (h2)
    o5 = o4 + h1            # bd2  (h1)
    o6 = o5 + in_dim        # bd3  (in_dim)

    b1 = b_ref[:, o0:o1]
    b2 = b_ref[:, o1:o2]
    bh = b_ref[:, o2:o3]
    bd1 = b_ref[:, o3:o4]
    bd2 = b_ref[:, o4:o5]
    bd3 = b_ref[:, o5:o6]

    x = x_ref[...]

    # ----- encoder: Linear(in_dim, 64) -> ReLU -> Linear(64, 32) -> ReLU -----
    h = jnp.dot(x.astype(bf16), w1_ref[...], preferred_element_type=f32) + b1
    h = jnp.maximum(h, 0.0)
    h = jnp.dot(h.astype(bf16), w2_ref[...], preferred_element_type=f32) + b2
    h = jnp.maximum(h, 0.0)

    # ----- fused latent heads: one [32, 2L] matmul -> [mu | logvar] -----
    mu_lv = jnp.dot(h.astype(bf16), wh_ref[...], preferred_element_type=f32) + bh
    mu = mu_lv[:, :L]
    lv = mu_lv[:, L:]

    # ----- reparameterization (kept in f32 for v5e's non-bf16 VPU/EUP) -----
    z = mu + eps_ref[...] * jnp.exp(0.5 * lv)

    # ----- decoder: Linear(L, 32) -> ReLU -> Linear(32, 64) -> ReLU -> Linear(64, in_dim)
    d = jnp.dot(z.astype(bf16), wd1_ref[...], preferred_element_type=f32) + bd1
    d = jnp.maximum(d, 0.0)
    d = jnp.dot(d.astype(bf16), wd2_ref[...], preferred_element_type=f32) + bd2
    d = jnp.maximum(d, 0.0)
    recon = jnp.dot(d.astype(bf16), wd3_ref[...], preferred_element_type=f32) + bd3

    # Single lane-dense packed store: [recon | mu | logvar].
    out_ref[...] = jnp.concatenate([recon, mu_lv], axis=-1)


@functools.partial(jax.jit, static_argnames=("block_b",))
def beta_vae_forward(x, eps, params, *, block_b=256):
    (w1, b1, w2, b2, wmu, bmu, wlv, blv,
     wd1, bd1, wd2, bd2, wd3, bd3) = params

    B, in_dim = x.shape
    latent_dim = wmu.shape[1]
    h1 = w1.shape[1]   # 64
    h2 = w2.shape[1]   # 32

    # Fuse heads and pack biases (wrapper-side layout plumbing).
    wh = jnp.concatenate([wmu, wlv], axis=1)
    b_all = jnp.concatenate([b1, b2, bmu, blv, bd1, bd2, bd3],
                            axis=1).astype(jnp.float32)

    # bf16 weights feed the MXU; accumulation stays f32 inside the kernel.
    bf = jnp.bfloat16
    w1b, w2b, whb = w1.astype(bf), w2.astype(bf), wh.astype(bf)
    wd1b, wd2b, wd3b = wd1.astype(bf), wd2.astype(bf), wd3.astype(bf)

    # Batch tiling: pad B up to a multiple of the batch tile.
    tb = min(block_b, _round_up(B, 8))
    Bp = _round_up(B, tb)
    if Bp != B:
        pad = Bp - B
        x = jnp.pad(x, ((0, pad), (0, 0)))
        eps = jnp.pad(eps, ((0, pad), (0, 0)))
    grid = (Bp // tb,)

    out_w = in_dim + 2 * latent_dim

    kernel = functools.partial(beta_vae_kernel, in_dim=in_dim,
                               latent_dim=latent_dim, h1=h1, h2=h2)

    # Advisory cost for XLA's scheduler.
    flops = 2 * Bp * (in_dim * h1 + h1 * h2 + h2 * 2 * latent_dim
                      + latent_dim * h2 + h2 * h1 + h1 * in_dim)
    bytes_accessed = ((Bp * in_dim + Bp * latent_dim) * 4
                      + sum(int(a.size) * a.dtype.itemsize
                            for a in (w1b, w2b, whb, wd1b, wd2b, wd3b, b_all))
                      + Bp * out_w * 4)

    const = lambda i: (0, 0)     # parameters: resident across batch tiles
    batched = lambda i: (i, 0)   # activations: tiled over batch

    packed = pl.pallas_call(
        kernel,
        out_shape=jax.ShapeDtypeStruct((Bp, out_w), jnp.float32),
        grid=grid,
        in_specs=[
            pl.BlockSpec((tb, in_dim), batched),
            pl.BlockSpec((tb, latent_dim), batched),
            pl.BlockSpec(w1b.shape, const),
            pl.BlockSpec(w2b.shape, const),
            pl.BlockSpec(whb.shape, const),
            pl.BlockSpec(wd1b.shape, const),
            pl.BlockSpec(wd2b.shape, const),
            pl.BlockSpec(wd3b.shape, const),
            pl.BlockSpec(b_all.shape, const),
        ],
        out_specs=pl.BlockSpec((tb, out_w), batched),
        compiler_params=pltpu.CompilerParams(
            dimension_semantics=("parallel",)),
        cost_estimate=pl.CostEstimate(
            flops=flops,
            transcendentals=Bp * latent_dim,
            bytes_accessed=bytes_accessed),
    )(x, eps, w1b, w2b, whb, wd1b, wd2b, wd3b, b_all)

    recon = packed[:B, :in_dim]
    mu = packed[:B, in_dim:in_dim + latent_dim]
    lv = packed[:B, in_dim + latent_dim:]
    return recon, mu, lv


def init_params(key, in_dim, latent_dim):
    """Deterministic init mirroring nn.Linear shapes (stored as [in, out])."""
    def linear(key, fan_in, fan_out):
        kw, kb = jax.random.split(key)
        bound = 1.0 / jnp.sqrt(fan_in)
        w = jax.random.uniform(kw, (fan_in, fan_out), jnp.float32, -bound, bound)
        b = jax.random.uniform(kb, (1, fan_out), jnp.float32, -bound, bound)
        return w, b

    keys = jax.random.split(key, 7)
    w1, b1 = linear(keys[0], in_dim, 64)
    w2, b2 = linear(keys[1], 64, 32)
    wmu, bmu = linear(keys[2], 32, latent_dim)
    wlv, blv = linear(keys[3], 32, latent_dim)
    wd1, bd1 = linear(keys[4], latent_dim, 32)
    wd2, bd2 = linear(keys[5], 32, 64)
    wd3, bd3 = linear(keys[6], 64, in_dim)
    return (w1, b1, w2, b2, wmu, bmu, wlv, blv, wd1, bd1, wd2, bd2, wd3, bd3)


def reference_forward(x, eps, params):
    """Pure-JAX reference mirroring the kernel's bf16-in / f32-accumulate dots."""
    (w1, b1, w2, b2, wmu, bmu, wlv, blv,
     wd1, bd1, wd2, bd2, wd3, bd3) = params
    bf = jnp.bfloat16

    def dot(a, w):
        return jnp.dot(a.astype(bf), w.astype(bf),
                       preferred_element_type=jnp.float32)

    h = jnp.maximum(dot(x, w1) + b1, 0.0)
    h = jnp.maximum(dot(h, w2) + b2, 0.0)
    mu = dot(h, wmu) + bmu
    lv = dot(h, wlv) + blv
    z = mu + eps * jnp.exp(0.5 * lv)
    d = jnp.maximum(dot(z, wd1) + bd1, 0.0)
    d = jnp.maximum(dot(d, wd2) + bd2, 0.0)
    recon = dot(d, wd3) + bd3
    return recon, mu, lv


if __name__ == "__main__":
    in_dim = 64
    latent_dim = 8
    batch = 256          # small demo, but enough rows to exercise 2 batch tiles
    block_b = 128        # batch tile; bump to 256-1024 for real batches

    root = jax.random.PRNGKey(0)
    k_params, k_x, k_eps = jax.random.split(root, 3)

    params = init_params(k_params, in_dim, latent_dim)
    x = jax.random.normal(k_x, (batch, in_dim), jnp.float32)
    # eps ~ N(0,1), drawn outside the kernel (torch.randn_like equivalent).
    eps = jax.random.normal(k_eps, (batch, latent_dim), jnp.float32)

    recon, mu, lv = beta_vae_forward(x, eps, params, block_b=block_b)
    jax.block_until_ready((recon, mu, lv))

    r_ref, mu_ref, lv_ref = reference_forward(x, eps, params)
    assert recon.shape == (batch, in_dim)
    assert mu.shape == (batch, latent_dim) and lv.shape == (batch, latent_dim)
    assert jnp.allclose(recon, r_ref, atol=2e-3), float(jnp.max(jnp.abs(recon - r_ref)))
    assert jnp.allclose(mu, mu_ref, atol=2e-3), float(jnp.max(jnp.abs(mu - mu_ref)))
    assert jnp.allclose(lv, lv_ref, atol=2e-3), float(jnp.max(jnp.abs(lv - lv_ref)))

    # TODO(synk): self.loss (MSE + beta*KLD) is training-only and not part of
    # forward(); omitted from the kernel.
    print("KERNEL_OK")
</pallas_src>

<mosaic_0001>
module attributes {stable_mosaic.version = 11 : i64} {
  func.func @beta_vae_kernel(%arg0: i32, %arg1: memref<128x64xf32, #tpu.memory_space<vmem>>, %arg2: memref<128x8xf32, #tpu.memory_space<vmem>>, %arg3: memref<64x64xbf16, #tpu.memory_space<vmem>>, %arg4: memref<64x32xbf16, #tpu.memory_space<vmem>>, %arg5: memref<32x16xbf16, #tpu.memory_space<vmem>>, %arg6: memref<8x32xbf16, #tpu.memory_space<vmem>>, %arg7: memref<32x64xbf16, #tpu.memory_space<vmem>>, %arg8: memref<64x64xbf16, #tpu.memory_space<vmem>>, %arg9: memref<1x272xf32, #tpu.memory_space<vmem>>, %arg10: memref<128x80xf32, #tpu.memory_space<vmem>>) attributes {dimension_semantics = [#tpu.dimension_semantics<parallel>], iteration_bounds = array<i64: 2>, scalar_prefetch = 0 : i64, scratch_operands = 0 : i64, tpu.core_type = #tpu.core_type<tc>, window_params = [{transform_indices = @transform_0, window_bounds = array<i64: 128, 64>}, {transform_indices = @transform_1, window_bounds = array<i64: 128, 8>}, {pipeline_mode = #tpu.pipeline_mode<synchronous>, transform_indices = @transform_2, window_bounds = array<i64: 64, 64>}, {pipeline_mode = #tpu.pipeline_mode<synchronous>, transform_indices = @transform_3, window_bounds = array<i64: 64, 32>}, {pipeline_mode = #tpu.pipeline_mode<synchronous>, transform_indices = @transform_4, window_bounds = array<i64: 32, 16>}, {pipeline_mode = #tpu.pipeline_mode<synchronous>, transform_indices = @transform_5, window_bounds = array<i64: 8, 32>}, {pipeline_mode = #tpu.pipeline_mode<synchronous>, transform_indices = @transform_6, window_bounds = array<i64: 32, 64>}, {pipeline_mode = #tpu.pipeline_mode<synchronous>, transform_indices = @transform_7, window_bounds = array<i64: 64, 64>}, {pipeline_mode = #tpu.pipeline_mode<synchronous>, transform_indices = @transform_8, window_bounds = array<i64: 1, 272>}, {transform_indices = @transform_9, window_bounds = array<i64: 128, 80>}]} {
    %c0 = arith.constant 0 : index
    %c0_0 = arith.constant 0 : index
    %0 = vector.load %arg9[%c0, %c0_0] : memref<1x272xf32, #tpu.memory_space<vmem>>, vector<1x64xf32>
    %c0_1 = arith.constant 0 : index
    %c64 = arith.constant 64 : index
    %1 = vector.load %arg9[%c0_1, %c64] : memref<1x272xf32, #tpu.memory_space<vmem>>, vector<1x32xf32>
    %c0_2 = arith.constant 0 : index
    %c96 = arith.constant 96 : index
    %2 = vector.load %arg9[%c0_2, %c96] : memref<1x272xf32, #tpu.memory_space<vmem>>, vector<1x16xf32>
    %c0_3 = arith.constant 0 : index
    %c112 = arith.constant 112 : index
    %3 = vector.load %arg9[%c0_3, %c112] : memref<1x272xf32, #tpu.memory_space<vmem>>, vector<1x32xf32>
    %c0_4 = arith.constant 0 : index
    %c144 = arith.constant 144 : index
    %4 = vector.load %arg9[%c0_4, %c144] : memref<1x272xf32, #tpu.memory_space<vmem>>, vector<1x64xf32>
    %c0_5 = arith.constant 0 : index
    %c208 = arith.constant 208 : index
    %5 = vector.load %arg9[%c0_5, %c208] : memref<1x272xf32, #tpu.memory_space<vmem>>, vector<1x64xf32>
    %c0_6 = arith.constant 0 : index
    %c0_7 = arith.constant 0 : index
    %6 = vector.load %arg1[%c0_6, %c0_7] : memref<128x64xf32, #tpu.memory_space<vmem>>, vector<128x64xf32>
    %7 = arith.truncf %6 : vector<128x64xf32> to vector<128x64xbf16>
    %c0_8 = arith.constant 0 : index
    %c0_9 = arith.constant 0 : index
    %8 = vector.load %arg3[%c0_8, %c0_9] : memref<64x64xbf16, #tpu.memory_space<vmem>>, vector<64x64xbf16>
    %cst = arith.constant dense<0.000000e+00> : vector<128x64xf32>
    %9 = tpu.matmul %7, %8, %cst {dimension_numbers = #tpu.dot_dimension_numbers<[1], [0], [0], [1], [0, 0, 1, 1], [], []>} : vector<128x64xbf16>, vector<64x64xbf16>, vector<128x64xf32> -> vector<128x64xf32>
    %10 = vector.broadcast %0 : vector<1x64xf32> to vector<128x64xf32>
    %11 = arith.addf %9, %10 : vector<128x64xf32>
    %cst_10 = arith.constant 0.000000e+00 : f32
    %12 = vector.broadcast %cst_10 : f32 to vector<128x64xf32>
    %13 = arith.maximumf %11, %12 : vector<128x64xf32>
    %14 = arith.truncf %13 : vector<128x64xf32> to vector<128x64xbf16>
    %c0_11 = arith.constant 0 : index
    %c0_12 = arith.constant 0 : index
    %15 = vector.load %arg4[%c0_11, %c0_12] : memref<64x32xbf16, #tpu.memory_space<vmem>>, vector<64x32xbf16>
    %cst_13 = arith.constant dense<0.000000e+00> : vector<128x32xf32>
    %16 = tpu.matmul %14, %15, %cst_13 {dimension_numbers = #tpu.dot_dimension_numbers<[1], [0], [0], [1], [0, 0, 1, 1], [], []>} : vector<128x64xbf16>, vector<64x32xbf16>, vector<128x32xf32> -> vector<128x32xf32>
    %17 = vector.broadcast %1 : vector<1x32xf32> to vector<128x32xf32>
    %18 = arith.addf %16, %17 : vector<128x32xf32>
    %cst_14 = arith.constant 0.000000e+00 : f32
    %19 = vector.broadcast %cst_14 : f32 to vector<128x32xf32>
    %20 = arith.maximumf %18, %19 : vector<128x32xf32>
    %21 = arith.truncf %20 : vector<128x32xf32> to vector<128x32xbf16>
    %c0_15 = arith.constant 0 : index
    %c0_16 = arith.constant 0 : index
    %22 = vector.load %arg5[%c0_15, %c0_16] : memref<32x16xbf16, #tpu.memory_space<vmem>>, vector<32x16xbf16>
    %cst_17 = arith.constant dense<0.000000e+00> : vector<128x16xf32>
    %23 = tpu.matmul %21, %22, %cst_17 {dimension_numbers = #tpu.dot_dimension_numbers<[1], [0], [0], [1], [0, 0, 1, 1], [], []>} : vector<128x32xbf16>, vector<32x16xbf16>, vector<128x16xf32> -> vector<128x16xf32>
    %24 = vector.broadcast %2 : vector<1x16xf32> to vector<128x16xf32>
    %25 = arith.addf %23, %24 : vector<128x16xf32>
    %26 = vector.extract_strided_slice %25 {offsets = [0, 0], sizes = [128, 8], strides = [1, 1]} : vector<128x16xf32> to vector<128x8xf32>
    %27 = vector.extract_strided_slice %25 {offsets = [0, 8], sizes = [128, 8], strides = [1, 1]} : vector<128x16xf32> to vector<128x8xf32>
    %c0_18 = arith.constant 0 : index
    %c0_19 = arith.constant 0 : index
    %28 = vector.load %arg2[%c0_18, %c0_19] : memref<128x8xf32, #tpu.memory_space<vmem>>, vector<128x8xf32>
    %cst_20 = arith.constant 5.000000e-01 : f32
    %29 = vector.broadcast %cst_20 : f32 to vector<128x8xf32>
    %30 = arith.mulf %29, %27 : vector<128x8xf32>
    %31 = math.exp %30 : vector<128x8xf32>
    %32 = arith.mulf %28, %31 : vector<128x8xf32>
    %33 = arith.addf %26, %32 : vector<128x8xf32>
    %34 = arith.truncf %33 : vector<128x8xf32> to vector<128x8xbf16>
    %c0_21 = arith.constant 0 : index
    %c0_22 = arith.constant 0 : index
    %35 = vector.load %arg6[%c0_21, %c0_22] : memref<8x32xbf16, #tpu.memory_space<vmem>>, vector<8x32xbf16>
    %cst_23 = arith.constant dense<0.000000e+00> : vector<128x32xf32>
    %36 = tpu.matmul %34, %35, %cst_23 {dimension_numbers = #tpu.dot_dimension_numbers<[1], [0], [0], [1], [0, 0, 1, 1], [], []>} : vector<128x8xbf16>, vector<8x32xbf16>, vector<128x32xf32> -> vector<128x32xf32>
    %37 = vector.broadcast %3 : vector<1x32xf32> to vector<128x32xf32>
    %38 = arith.addf %36, %37 : vector<128x32xf32>
    %cst_24 = arith.constant 0.000000e+00 : f32
    %39 = vector.broadcast %cst_24 : f32 to vector<128x32xf32>
    %40 = arith.maximumf %38, %39 : vector<128x32xf32>
    %41 = arith.truncf %40 : vector<128x32xf32> to vector<128x32xbf16>
    %c0_25 = arith.constant 0 : index
    %c0_26 = arith.constant 0 : index
    %42 = vector.load %arg7[%c0_25, %c0_26] : memref<32x64xbf16, #tpu.memory_space<vmem>>, vector<32x64xbf16>
    %cst_27 = arith.constant dense<0.000000e+00> : vector<128x64xf32>
    %43 = tpu.matmul %41, %42, %cst_27 {dimension_numbers = #tpu.dot_dimension_numbers<[1], [0], [0], [1], [0, 0, 1, 1], [], []>} : vector<128x32xbf16>, vector<32x64xbf16>, vector<128x64xf32> -> vector<128x64xf32>
    %44 = vector.broadcast %4 : vector<1x64xf32> to vector<128x64xf32>
    %45 = arith.addf %43, %44 : vector<128x64xf32>
    %cst_28 = arith.constant 0.000000e+00 : f32
    %46 = vector.broadcast %cst_28 : f32 to vector<128x64xf32>
    %47 = arith.maximumf %45, %46 : vector<128x64xf32>
    %48 = arith.truncf %47 : vector<128x64xf32> to vector<128x64xbf16>
    %c0_29 = arith.constant 0 : index
    %c0_30 = arith.constant 0 : index
    %49 = vector.load %arg8[%c0_29, %c0_30] : memref<64x64xbf16, #tpu.memory_space<vmem>>, vector<64x64xbf16>
    %cst_31 = arith.constant dense<0.000000e+00> : vector<128x64xf32>
    %50 = tpu.matmul %48, %49, %cst_31 {dimension_numbers = #tpu.dot_dimension_numbers<[1], [0], [0], [1], [0, 0, 1, 1], [], []>} : vector<128x64xbf16>, vector<64x64xbf16>, vector<128x64xf32> -> vector<128x64xf32>
    %51 = vector.broadcast %5 : vector<1x64xf32> to vector<128x64xf32>
    %52 = arith.addf %50, %51 : vector<128x64xf32>
    %53 = tpu.concatenate %52, %25 in 1 : vector<128x64xf32>, vector<128x16xf32> -> vector<128x80xf32>
    %c0_32 = arith.constant 0 : index
    %c0_33 = arith.constant 0 : index
    %54 = vector.load %arg10[%c0_32, %c0_33] : memref<128x80xf32, #tpu.memory_space<vmem>>, vector<128x80xf32>
    tpu.vector_store %arg10[%c0_32, %c0_33], %53 {strides = array<i32>} : memref<128x80xf32, #tpu.memory_space<vmem>>, vector<128x80xf32>,
    return
  }
  func.func @transform_0(%arg0: i32) -> (i32, i32) {
    %c0_i32 = arith.constant 0 : i32
    %c0_i32_0 = arith.constant 0 : i32
    return %arg0, %c0_i32 : i32, i32
  }
  func.func @transform_1(%arg0: i32) -> (i32, i32) {
    %c0_i32 = arith.constant 0 : i32
    %c0_i32_0 = arith.constant 0 : i32
    return %arg0, %c0_i32 : i32, i32
  }
  func.func @transform_2(%arg0: i32) -> (i32, i32) {
    %c0_i32 = arith.constant 0 : i32
    %c0_i32_0 = arith.constant 0 : i32
    %c0_i32_1 = arith.constant 0 : i32
    return %c0_i32, %c0_i32_0 : i32, i32
  }
  func.func @transform_3(%arg0: i32) -> (i32, i32) {
    %c0_i32 = arith.constant 0 : i32
    %c0_i32_0 = arith.constant 0 : i32
    %c0_i32_1 = arith.constant 0 : i32
    return %c0_i32, %c0_i32_0 : i32, i32
  }
  func.func @transform_4(%arg0: i32) -> (i32, i32) {
    %c0_i32 = arith.constant 0 : i32
    %c0_i32_0 = arith.constant 0 : i32
    %c0_i32_1 = arith.constant 0 : i32
    return %c0_i32, %c0_i32_0 : i32, i32
  }
  func.func @transform_5(%arg0: i32) -> (i32, i32) {
    %c0_i32 = arith.constant 0 : i32
    %c0_i32_0 = arith.constant 0 : i32
    %c0_i32_1 = arith.constant 0 : i32
    return %c0_i32, %c0_i32_0 : i32, i32
  }
  func.func @transform_6(%arg0: i32) -> (i32, i32) {
    %c0_i32 = arith.constant 0 : i32
    %c0_i32_0 = arith.constant 0 : i32
    %c0_i32_1 = arith.constant 0 : i32
    return %c0_i32, %c0_i32_0 : i32, i32
  }
  func.func @transform_7(%arg0: i32) -> (i32, i32) {
    %c0_i32 = arith.constant 0 : i32
    %c0_i32_0 = arith.constant 0 : i32
    %c0_i32_1 = arith.constant 0 : i32
    return %c0_i32, %c0_i32_0 : i32, i32
  }
  func.func @transform_8(%arg0: i32) -> (i32, i32) {
    %c0_i32 = arith.constant 0 : i32
    %c0_i32_0 = arith.constant 0 : i32
    %c0_i32_1 = arith.constant 0 : i32
    return %c0_i32, %c0_i32_0 : i32, i32
  }
  func.func @transform_9(%arg0: i32) -> (i32, i32) {
    %c0_i32 = arith.constant 0 : i32
    %c0_i32_0 = arith.constant 0 : i32
    return %arg0, %c0_i32 : i32, i32
  }
}

</mosaic_0001>

<bundles_post_ra>
// kernel: beta_vae_forward.1
= control target key start
LH: loop header
LB: loop body
LE: loop exit
PB: predicated region body
PF: predicated region fallthrough
CT: control target
= control target key end

     0   :  { %s2131_s30 = smov 0   ;;  %s2522_s0 = inlined_call_operand.vmem [shape: f32[256,64], index: 0, kind: input, shape index: {}]   ;;  %s2523_s1 = inlined_call_operand.vmem [shape: f32[256,8], index: 1, kind: input, shape index: {}]   ;;  %s2524_s2 = inlined_call_operand.vmem [shape: bf16[64,64], index: 2, kind: input, shape index: {}]   ;;  %s2525_s3 = inlined_call_operand.vmem [shape: bf16[64,32], index: 3, kind: input, shape index: {}]   ;;  %s2526_s4 = inlined_call_operand.vmem [shape: bf16[32,16], index: 4, kind: input, shape index: {}]   ;;  %s2527_s5 = inlined_call_operand.vmem [shape: bf16[8,32], index: 5, kind: input, shape index: {}]   ;;  %s2528_s6 = inlined_call_operand.vmem [shape: bf16[32,64], index: 6, kind: input, shape index: {}]   ;;  %s2529_s7 = inlined_call_operand.vmem [shape: bf16[64,64], index: 7, kind: input, shape index: {}]   ;;  %s2530_s8 = inlined_call_operand.vmem [shape: f32[1,272], index: 8, kind: input, shape index: {}]   ;;  %s2531_s9 = inlined_call_operand.vmem [shape: f32[256,80], index: 9, kind: output, shape index: {}]  }
   0x1 LB: > { %s1730_s10 = sadd.s32 4294967295, %s2073_s30   ;;  %p1734_p0 = scmp.ge.s32.totalorder %s2073_s30, 1  ;;  %s2073_s30 = sphi %s2131_s30, %s19_s30  }
   0x2   : > { %p299_p1 = scmp.lt.s32.totalorder %s2073_s30, 3 }
   0x4   : > { %p300_p2 = pnand %p1734_p0, %p299_p1 }
   0x5   : > { %v2019_v0 = vld [vmem:[%s2524_s2] sm:$0xff] (!%p300_p2)   ;;  %s1735_s13 = sshll.u32 (!%p300_p2), %s1730_s10, 4  ;;  %v2020_v1 = vld [vmem:[%s2524_s2 + $0x8] sm:$0xff] (!%p300_p2)   ;;  %v2021_v2 = vld [vmem:[%s2524_s2 + $0x10] sm:$0xff] (!%p300_p2)   ;;  %vm425_vm0 = vcmask (!%p300_p2), 523264   ;;  %s2075_s18 = smov (!%p300_p2), 64  }
   0x6   : > { %303 = sbr.rel (%p300_p2) target bundleno = 1512 (0x5e8), region = 56  ;;  %p341_p3 = scmp.lt.s32.totalorder (!%p300_p2), %s1735_s13, 31  ;;  %1874 = vmatprep.subr.bf16.mxu0 (!%p300_p2), %v2019_v0  ;;  %v2023_v3 = vld [vmem:[%s2525_s3] sm:$0xff] (!%p300_p2)   ;;  %v2024_v4 = vld [vmem:[%s2525_s3 + $0x8] sm:$0xff] (!%p300_p2)   ;;  %v2022_v7 = vld [vmem:[%s2524_s2 + $0x18] sm:$0xff] (!%p300_p2)   ;;  %vm770_vm1 = vcmask (!%p300_p2), 261120  }
   0x7   : > { %1875 = vmatpush3.bf16.msra.mxu0 (!%p300_p2), %v2019_v0  ;;  %1898 = vmatprep.subr.bf16.mxu1 (!%p300_p2), %v2023_v3  ;;  %v2025_v30 = vld [vmem:[%s2525_s3 + $0x10] sm:$0xff] (!%p300_p2)   ;;  %v2026_v31 = vld [vmem:[%s2525_s3 + $0x18] sm:$0xff] (!%p300_p2)   ;;  %v2198_v32 = vld [vmem:[%s2530_s8] ss:$0 sm:$0xff] (!%p300_p2)  ;;  %s2076_s19 = smov (!%p300_p2), 32   ;;  %vm1102_vm2 = vcmask (!%p300_p2), 1043456  }
   0x8   : > { %1876 = vmatprep.subr.bf16.mxu0 (!%p300_p2), %v2020_v1  ;;  %1899 = vmatpush3.bf16.msra.mxu1 (!%p300_p2), %v2023_v3  ;;  %v2027_v33 = vld [vmem:[%s2526_s4] sm:$0xff] (!%p300_p2)   ;;  %v2028_v34 = vld [vmem:[%s2526_s4 + $0x8] sm:$0xff] (!%p300_p2)   ;;  %s2077_s23 = smov (!%p300_p2), 120   ;;  %s2078_s26 = smov (!%p300_p2), 16   ;;  %vm1077_vm3 = vcmask (!%p300_p2), 64512   ;;  %vm1074_vm4 = vcmask (!%p300_p2), 130048  }
   0x9   : > { %1900 = vmatprep.subr.bf16.mxu1 (!%p300_p2), %v2024_v4  ;;  %603 = vrot.lane.b32.xlu0 (!%p300_p2), %v2198_v32, %s2075_s18  ;;  %s2079_s11 = smov (!%p300_p2), 112   ;;  %s2080_s12 = smov (!%p300_p2), 48   ;;  %vm1441_vm5 = vcmask (!%p300_p2), 392192   ;;  %vm1645_vm6 = vcmask (!%p300_p2), 654336  }
   0xb   : > { %1877 = vmatpush3.bf16.msra.mxu0 (!%p300_p2), %v2020_v1 }
   0xc   : > { %1878 = vmatprep.subr.bf16.mxu0 (!%p300_p2), %v2021_v2  ;;  %1901 = vmatpush3.bf16.msra.mxu1 (!%p300_p2), %v2024_v4 }
   0xd   : > { %s2533_s13 = smov (!%p341_p3, %s1735_s13), 31  ;;  %1902 = vmatprep.subr.bf16.mxu1 %v2025_v30  ;;  %767 = vrot.lane.b32.xlu0 %v2198_v32, %s2076_s19 }
   0xe   : > { %s2151_s20 = sshll.u32 %s2533_s13, 3 }
   0xf   : > { %s2160_s25 = scalar_lea.vmem %s2522_s0, %s2151_s20  ;;  %1879 = vmatpush3.bf16.msra.mxu0 %v2021_v2  ;;  %s2377_s21 = scalar_lea.vmem %s2523_s1, %s2151_s20 }
  0x10   : > { %v363_v5 = vld [vmem:[%s2160_s25] sm:$0xff]  ;;  %v364_v6 = vld [vmem:[%s2160_s25 + $0x8] sm:$0xff]  ;;  %v365_v9 = vld [vmem:[%s2160_s25 + $0x10] sm:$0xff]  ;;  %1880 = vmatprep.subr.bf16.mxu0 %v2022_v7  ;;  %1903 = vmatpush3.bf16.msra.mxu1 %v2025_v30 }
  0x11   : > { %v379_v8 = vpack.c.bf16 %v364_v6, %v363_v5  ;;  %v366_v10 = vld [vmem:[%s2160_s25 + $0x18] sm:$0xff]  ;;  %v367_v11 = vld [vmem:[%s2160_s25 + $0x20] sm:$0xff]  ;;  %v368_v12 = vld [vmem:[%s2160_s25 + $0x28] sm:$0xff]  ;;  %1904 = vmatprep.subr.bf16.mxu1 %v2026_v31 }
  0x12   : > { %v380_v13 = vpack.c.bf16 %v366_v10, %v365_v9  ;;  %v381_v14 = vpack.c.bf16 %v368_v12, %v367_v11  ;;  %v369_v15 = vld [vmem:[%s2160_s25 + $0x30] sm:$0xff]  ;;  %v370_v16 = vld [vmem:[%s2160_s25 + $0x38] sm:$0xff]  ;;  %v371_v17 = vld [vmem:[%s2160_s25 + $0x40] sm:$0xff] }
  0x13   : > { %1882 = vmatprep.mubr.msk.bf16.mxu0 %vm425_vm0, %v379_v8  ;;  %1881 = vmatpush3.bf16.msra.mxu0 %v2022_v7  ;;  %v372_v18 = vld [vmem:[%s2160_s25 + $0x48] sm:$0xff]  ;;  %v382_v19 = vpack.c.bf16 %v370_v16, %v369_v15  ;;  %v373_v21 = vld [vmem:[%s2160_s25 + $0x50] sm:$0xff]  ;;  %v374_v22 = vld [vmem:[%s2160_s25 + $0x58] sm:$0xff] }
  0x14   : > { %v383_v20 = vpack.c.bf16 %v372_v18, %v371_v17  ;;  %v375_v23 = vld [vmem:[%s2160_s25 + $0x60] sm:$0xff]  ;;  %v376_v24 = vld [vmem:[%s2160_s25 + $0x68] sm:$0xff]  ;;  %v384_v25 = vpack.c.bf16 %v374_v22, %v373_v21  ;;  %v377_v27 = vld [vmem:[%s2160_s25 + $0x70] sm:$0xff]  ;;  %1905 = vmatpush3.bf16.msra.mxu1 %v2026_v31  ;;  %1922 = vmatprep.subr.bf16.mxu0 %v2027_v33 }
  0x15   : > { %v385_v26 = vpack.c.bf16 %v376_v24, %v375_v23  ;;  %v378_v28 = vld [vmem:[%s2160_s25 + $0x78] sm:$0xff] }
  0x16   : > { %1883 = vmatmul.mubr.msk.bf16.vlgmr.msra.gmra.mrb[0].mxu0 %vm425_vm0, %v380_v13  ;;  %v386_v29 = vpack.c.bf16 %v378_v28, %v377_v27 }
  0x17   : > { %1886 = vmatprep.mubr.msk.bf16.mxu0 %vm425_vm0, %v381_v14  ;;  %1923 = vmatpush3.bf16.msra.mxu0 %v2027_v33 }
  0x18   : > { %1924 = vmatprep.subr.bf16.mxu0 %v2028_v34 }
  0x1b   : > { %1925 = vmatpush3.bf16.msra.mxu0 %v2028_v34 }
  0x1e   : > { %1887 = vmatmul.mubr.msk.bf16.gmra.mrb[4].mxu0 %vm425_vm0, %v382_v19 }
  0x1f   : > { %1890 = vmatprep.mubr.msk.bf16.mxu0 %vm425_vm0, %v383_v20 }
  0x26   : > { %1891 = vmatmul.mubr.msk.bf16.gmra.mrb[8].mxu0 %vm425_vm0, %v384_v25 }
  0x27   : > { %1894 = vmatprep.mubr.msk.bf16.mxu0 %vm425_vm0, %v385_v26 }
  0x2e   : > { %1895 = vmatmul.mubr.msk.bf16.gmra.mrb[12].mxu0 %vm425_vm0, %v386_v29 }
  0x7b   : > { %v604_v27 = vpop.permute.xlu0 %603 }
  0xe9   : > { %v1884_v35 = vpop.f32.mrb[0].mxu0 }
  0xea   : > { %v493_v36 = vadd.f32 %v1884_v35, %v2198_v32  ;;  %v484_v37 = vpop.f32.mrb[1].mxu0 }
  0xeb   : > { %v485_v38 = vadd.f32 %v2198_v32, %v484_v37  ;;  %v1885_v39 = vpop.f32.mrb[2].mxu0 }
  0xec   : > { %v496_v40 = vadd.f32 %v1885_v39, %v2198_v32  ;;  %v487_v41 = vpop.f32.mrb[3].mxu0  ;;  %v549_v43 = vmax.f32 %v493_v36, 0.0 }
  0xed   : > { %v488_v42 = vadd.f32 %v2198_v32, %v487_v41  ;;  %v547_v45 = vmax.f32 %v485_v38, 0.0 }
  0xee   : > { %v550_v44 = vmax.f32 %v496_v40, 0.0 }
  0xef   : > { %v548_v46 = vmax.f32 %v488_v42, 0.0 }
  0xf0   : > { %v564_v47 = vpack.c.bf16 %v550_v44, %v549_v43 }
  0xf1   : > { %v1888_v48 = vpop.f32.mrb[4].mxu0  ;;  %v563_v49 = vpack.c.bf16 %v548_v46, %v547_v45 }
  0xf2   : > { %v509_v50 = vadd.f32 %v1888_v48, %v2198_v32  ;;  %v500_v51 = vpop.f32.mrb[5].mxu0 }
  0xf3   : > { %v501_v52 = vadd.f32 %v2198_v32, %v500_v51  ;;  %v1889_v53 = vpop.f32.mrb[6].mxu0  ;;  %1906 = vmatprep.mubr.msk.bf16.mxu1 %vm425_vm0, %v563_v49 }
  0xf4   : > { %v553_v54 = vmax.f32 %v509_v50, 0.0  ;;  %v512_v55 = vadd.f32 %v1889_v53, %v2198_v32  ;;  %v503_v56 = vpop.f32.mrb[7].mxu0  ;;  %1907 = vmatmul.mubr.msk.bf16.vlgmr.msra.gmra.mrb[0].mxu1 %vm425_vm0, %v564_v47 }
  0xf5   : > { %v551_v57 = vmax.f32 %v501_v52, 0.0  ;;  %v504_v58 = vadd.f32 %v2198_v32, %v503_v56 }
  0xf6   : > { %v554_v59 = vmax.f32 %v512_v55, 0.0 }
  0xf7   : > { %v552_v60 = vmax.f32 %v504_v58, 0.0 }
  0xf8   : > { %v566_v61 = vpack.c.bf16 %v554_v59, %v553_v54 }
  0xf9   : > { %v565_v62 = vpack.c.bf16 %v552_v60, %v551_v57  ;;  %v1892_v63 = vpop.f32.mrb[8].mxu0 }
  0xfa   : > { %v525_v0 = vadd.f32 %v1892_v63, %v2198_v32  ;;  %v516_v1 = vpop.f32.mrb[9].mxu0 }
  0xfb   : > { %v517_v2 = vadd.f32 %v2198_v32, %v516_v1  ;;  %v1893_v3 = vpop.f32.mrb[10].mxu0  ;;  %1910 = vmatprep.mubr.msk.bf16.mxu1 %vm425_vm0, %v565_v62 }
  0xfc   : > { %v557_v4 = vmax.f32 %v525_v0, 0.0  ;;  %v528_v5 = vadd.f32 %v1893_v3, %v2198_v32  ;;  %v519_v6 = vpop.f32.mrb[11].mxu0  ;;  %1911 = vmatmul.mubr.msk.bf16.gmra.mrb[4].mxu1 %vm425_vm0, %v566_v61 }
  0xfd   : > { %v555_v7 = vmax.f32 %v517_v2, 0.0  ;;  %v520_v8 = vadd.f32 %v2198_v32, %v519_v6 }
  0xfe   : > { %v558_v9 = vmax.f32 %v528_v5, 0.0 }
  0xff   : > { %v556_v10 = vmax.f32 %v520_v8, 0.0 }
 0x100   : > { %v568_v11 = vpack.c.bf16 %v558_v9, %v557_v4 }
 0x101   : > { %v567_v12 = vpack.c.bf16 %v556_v10, %v555_v7  ;;  %v1896_v13 = vpop.f32.mrb[12].mxu0 }
 0x102   : > { %v541_v14 = vadd.f32 %v1896_v13, %v2198_v32  ;;  %v532_v15 = vpop.f32.mrb[13].mxu0 }
 0x103   : > { %v533_v16 = vadd.f32 %v2198_v32, %v532_v15  ;;  %v1897_v17 = vpop.f32.mrb[14].mxu0  ;;  %1914 = vmatprep.mubr.msk.bf16.mxu1 %vm425_vm0, %v567_v12 }
 0x104   : > { %v561_v18 = vmax.f32 %v541_v14, 0.0  ;;  %v544_v19 = vadd.f32 %v1897_v17, %v2198_v32  ;;  %v535_v20 = vpop.f32.mrb[15].mxu0  ;;  %1915 = vmatmul.mubr.msk.bf16.gmra.mrb[8].mxu1 %vm425_vm0, %v568_v11 }
 0x105   : > { %v559_v21 = vmax.f32 %v533_v16, 0.0  ;;  %v536_v22 = vadd.f32 %v2198_v32, %v535_v20  ;;  %v1060_v20 = vld [vmem:[%s2527_s5] sm:$0xf] }
 0x106   : > { %v562_v23 = vmax.f32 %v544_v19, 0.0  ;;  %2004 = vmatprep.subr.msk.bf16.mxu1 %vm1102_vm2, %v1060_v20 }
 0x107   : > { %v560_v24 = vmax.f32 %v536_v22, 0.0  ;;  %v2244_v22 = vpop.permute.xlu0 %767 }
 0x108   : > { %v570_v25 = vpack.c.bf16 %v562_v23, %v561_v18 }
 0x109   : > { %v569_v26 = vpack.c.bf16 %v560_v24, %v559_v21  ;;  %v1104_v21 = vsel %vm1102_vm2, %v1060_v20, 0 }
 0x10a   : > { %1943 = vmatpush3.bf16.msra.mxu1 %v1104_v21 }
 0x10b   : > { %1918 = vmatprep.mubr.msk.bf16.mxu1 %vm425_vm0, %v569_v26 }
 0x10c   : > { %1919 = vmatmul.mubr.msk.bf16.gmra.mrb[12].mxu1 %vm425_vm0, %v570_v25 }
 0x1c7   : > { %v1908_v28 = vpop.f32.mrb[0].mxu1 }
 0x1c8   : > { %v673_v29 = vadd.f32 %v1908_v28, %v604_v27  ;;  %v664_v30 = vpop.f32.mrb[1].mxu1 }
 0x1c9   : > { %v665_v31 = vadd.f32 %v664_v30, %v604_v27  ;;  %v1909_v33 = vpop.f32.mrb[2].mxu1 }
 0x1ca   : > { %v676_v34 = vadd.f32 %v1909_v33, %v604_v27  ;;  %v667_v35 = vpop.f32.mrb[3].mxu1  ;;  %v729_v37 = vmax.f32 %v673_v29, 0.0 }
 0x1cb   : > { %v668_v36 = vadd.f32 %v667_v35, %v604_v27  ;;  %v727_v39 = vmax.f32 %v665_v31, 0.0 }
 0x1cc   : > { %v730_v38 = vmax.f32 %v676_v34, 0.0 }
 0x1cd   : > { %v728_v40 = vmax.f32 %v668_v36, 0.0 }
 0x1ce   : > { %v744_v41 = vpack.c.bf16 %v730_v38, %v729_v37 }
 0x1cf   : > { %v743_v42 = vpack.c.bf16 %v728_v40, %v727_v39  ;;  %v1912_v43 = vpop.f32.mrb[4].mxu1 }
 0x1d0   : > { %v689_v44 = vadd.f32 %v1912_v43, %v604_v27  ;;  %v680_v45 = vpop.f32.mrb[5].mxu1 }
 0x1d1   : > { %v681_v32 = vadd.f32 %v680_v45, %v604_v27  ;;  %v1913_v46 = vpop.f32.mrb[6].mxu1  ;;  %1926 = vmatprep.mubr.msk.bf16.mxu0 %vm770_vm1, %v743_v42 }
 0x1d2   : > { %v692_v47 = vadd.f32 %v1913_v46, %v604_v27  ;;  %v683_v48 = vpop.f32.mrb[7].mxu1  ;;  %1927 = vmatmul.mubr.msk.bf16.vlgmr.msra.gmra.mrb[16].mxu0 %vm770_vm1, %v744_v41  ;;  %v733_v50 = vmax.f32 %v689_v44, 0.0 }
 0x1d3   : > { %v684_v49 = vadd.f32 %v683_v48, %v604_v27  ;;  %v731_v52 = vmax.f32 %v681_v32, 0.0 }
 0x1d4   : > { %v734_v51 = vmax.f32 %v692_v47, 0.0 }
 0x1d5   : > { %v732_v53 = vmax.f32 %v684_v49, 0.0 }
 0x1d6   : > { %v746_v54 = vpack.c.bf16 %v734_v51, %v733_v50 }
 0x1d7   : > { %v745_v55 = vpack.c.bf16 %v732_v53, %v731_v52  ;;  %v1916_v56 = vpop.f32.mrb[8].mxu1 }
 0x1d8   : > { %v705_v57 = vadd.f32 %v1916_v56, %v604_v27  ;;  %v696_v58 = vpop.f32.mrb[9].mxu1 }
 0x1d9   : > { %v697_v59 = vadd.f32 %v696_v58, %v604_v27  ;;  %v1917_v60 = vpop.f32.mrb[10].mxu1  ;;  %1930 = vmatprep.mubr.msk.bf16.mxu0 %vm770_vm1, %v745_v55 }
 0x1da   : > { %v708_v61 = vadd.f32 %v1917_v60, %v604_v27  ;;  %v699_v62 = vpop.f32.mrb[11].mxu1  ;;  %1931 = vmatmul.mubr.msk.bf16.gmra.mrb[20].mxu0 %vm770_vm1, %v746_v54  ;;  %v737_v0 = vmax.f32 %v705_v57, 0.0 }
 0x1db   : > { %v700_v63 = vadd.f32 %v699_v62, %v604_v27  ;;  %v735_v2 = vmax.f32 %v697_v59, 0.0 }
 0x1dc   : > { %v738_v1 = vmax.f32 %v708_v61, 0.0 }
 0x1dd   : > { %v736_v3 = vmax.f32 %v700_v63, 0.0 }
 0x1de   : > { %v748_v4 = vpack.c.bf16 %v738_v1, %v737_v0 }
 0x1df   : > { %v747_v5 = vpack.c.bf16 %v736_v3, %v735_v2  ;;  %v1920_v6 = vpop.f32.mrb[12].mxu1 }
 0x1e0   : > { %v721_v7 = vadd.f32 %v1920_v6, %v604_v27  ;;  %v712_v8 = vpop.f32.mrb[13].mxu1 }
 0x1e1   : > { %v713_v9 = vadd.f32 %v712_v8, %v604_v27  ;;  %v1921_v10 = vpop.f32.mrb[14].mxu1  ;;  %1934 = vmatprep.mubr.msk.bf16.mxu0 %vm770_vm1, %v747_v5 }
 0x1e2   : > { %v724_v11 = vadd.f32 %v1921_v10, %v604_v27  ;;  %v715_v12 = vpop.f32.mrb[15].mxu1  ;;  %1935 = vmatmul.mubr.msk.bf16.gmra.mrb[24].mxu0 %vm770_vm1, %v748_v4  ;;  %v741_v14 = vmax.f32 %v721_v7, 0.0 }
 0x1e3   : > { %v716_v13 = vadd.f32 %v715_v12, %v604_v27  ;;  %v739_v16 = vmax.f32 %v713_v9, 0.0 }
 0x1e4   : > { %v742_v15 = vmax.f32 %v724_v11, 0.0 }
 0x1e5   : > { %v740_v17 = vmax.f32 %v716_v13, 0.0 }
 0x1e6   : > { %v750_v18 = vpack.c.bf16 %v742_v15, %v741_v14 }
 0x1e7   : > { %v749_v19 = vpack.c.bf16 %v740_v17, %v739_v16 }
 0x1e9   : > { %1938 = vmatprep.mubr.msk.bf16.mxu0 %vm770_vm1, %v749_v19 }
 0x1ea   : > { %1939 = vmatmul.mubr.msk.bf16.gmra.mrb[28].mxu0 %vm770_vm1, %v750_v18 }
 0x2a5   : > { %v1928_v23 = vpop.f32.mrb[16].mxu0 }
 0x2a6   : > { %v2247_v24 = vadd.f32 %v1928_v23, %v2244_v22  ;;  %v829_v25 = vpop.f32.mrb[17].mxu0 }
 0x2a7   : > { %v2250_v26 = vadd.f32 %v829_v25, %v2244_v22  ;;  %v1929_v27 = vpop.f32.mrb[18].mxu0 }
 0x2a8   : > { %v910_v28 = vmul.f32 0.5, %v2247_v24  ;;  %v2254_v29 = vadd.f32 %v1929_v27, %v2244_v22  ;;  %v832_v30 = vpop.f32.mrb[19].mxu0 }
 0x2a9   : > { %v908_v31 = vmul.f32 0.5, %v2250_v26  ;;  %v2258_v33 = vadd.f32 %v832_v30, %v2244_v22 }
 0x2aa   : > { %v928_v34 = vmul.f32 1.442695, %v910_v28  ;;  %v911_v37 = vmul.f32 0.5, %v2254_v29 }
 0x2ab   : > { %v924_v35 = vmul.f32 1.442695, %v908_v31  ;;  %v909_v36 = vmul.f32 0.5, %v2258_v33 }
 0x2ac   : > { %2035 = vpow2.f32 %v928_v34  ;;  %v930_v44 = vmul.f32 1.442695, %v911_v37 }
 0x2ad   : > { %2037 = vpow2.f32 %v924_v35  ;;  %v926_v38 = vmul.f32 1.442695, %v909_v36  ;;  %v1932_v39 = vpop.f32.mrb[20].mxu0 }
 0x2ae   : > { %v2263_v40 = vadd.f32 %v1932_v39, %v2244_v22  ;;  %v845_v41 = vpop.f32.mrb[21].mxu0 }
 0x2af   : > { %v2266_v42 = vadd.f32 %v845_v41, %v2244_v22  ;;  %v1933_v43 = vpop.f32.mrb[22].mxu0  ;;  %2039 = vpow2.f32 %v926_v38 }
 0x2b0   : > { %v914_v45 = vmul.f32 0.5, %v2263_v40  ;;  %v2270_v32 = vadd.f32 %v1933_v43, %v2244_v22  ;;  %v848_v46 = vpop.f32.mrb[23].mxu0  ;;  %2041 = vpow2.f32 %v930_v44 }
 0x2b1   : > { %v912_v47 = vmul.f32 0.5, %v2266_v42  ;;  %v2274_v48 = vadd.f32 %v848_v46, %v2244_v22  ;;  %v360_v46 = vld [vmem:[%s2530_s8] sm:$0x3] }
 0x2b2   : > { %v936_v51 = vmul.f32 1.442695, %v914_v45  ;;  %v915_v52 = vmul.f32 0.5, %v2270_v32 }
 0x2b3   : > { %v932_v49 = vmul.f32 1.442695, %v912_v47  ;;  %v913_v50 = vmul.f32 0.5, %v2274_v48 }
 0x2b4   : > { %v938_v61 = vmul.f32 1.442695, %v915_v52 }
 0x2b5   : > { %2043 = vpow2.f32 %v932_v49  ;;  %v934_v53 = vmul.f32 1.442695, %v913_v50  ;;  %v1936_v54 = vpop.f32.mrb[24].mxu0 }
 0x2b6   : > { %v2036_v55 = vpop.eup %2035  ;;  %v2279_v56 = vadd.f32 %v1936_v54, %v2244_v22  ;;  %v861_v57 = vpop.f32.mrb[25].mxu0  ;;  %2045 = vpow2.f32 %v936_v51  ;;  %v1784_v54 = vld [vmem:[%s2530_s8 + $0x1] ss:$0 sm:$0xff] }
 0x2b7   : > { %v2038_v58 = vpop.eup %2037  ;;  %v2282_v59 = vadd.f32 %v861_v57, %v2244_v22  ;;  %976 = vrot.lane.b32.xlu0 %v2036_v55, %s2077_s23  ;;  %v1937_v60 = vpop.f32.mrb[26].mxu0  ;;  %2047 = vpow2.f32 %v934_v53  ;;  %v362_v55 = vld [vmem:[%s2530_s8 + $0x1] sm:$0x3] }
 0x2b8   : > { %v918_v62 = vmul.f32 0.5, %v2279_v56  ;;  %v2287_v63 = vadd.f32 %v1937_v60, %v2244_v22  ;;  %v864_v0 = vpop.f32.mrb[27].mxu0  ;;  %972 = vrot.lane.b32.xlu1 %v2038_v58, %s2077_s23  ;;  %2049 = vpow2.f32 %v938_v61  ;;  %v2029_v60 = vld [vmem:[%s2528_s6] sm:$0xff]   ;;  %v2030_v61 = vld [vmem:[%s2528_s6 + $0x8] sm:$0xff]  }
 0x2b9   : > { %v916_v1 = vmul.f32 0.5, %v2282_v59  ;;  %v2292_v2 = vadd.f32 %v864_v0, %v2244_v22  ;;  %v2040_v3 = vpop.eup %2039  ;;  %1960 = vmatprep.subr.bf16.mxu0 %v2029_v60 }
 0x2ba   : > { %v944_v6 = vmul.f32 1.442695, %v918_v62  ;;  %v919_v7 = vmul.f32 0.5, %v2287_v63  ;;  %v2042_v10 = vpop.eup %2041  ;;  %1961 = vmatpush3.bf16.msra.mxu0 %v2029_v60  ;;  %v892_v62 = vld [vmem:[%s2377_s21] sm:$0xff] }
 0x2bb   : > { %v940_v4 = vmul.f32 1.442695, %v916_v1  ;;  %v917_v5 = vmul.f32 0.5, %v2292_v2  ;;  %1962 = vmatprep.subr.bf16.mxu0 %v2030_v61  ;;  %v893_v1 = vld [vmem:[%s2377_s21 + $0x8] sm:$0xff] }
 0x2bc   : > { %974 = vrot.lane.b32.xlu1 %v2040_v3, %s2077_s23  ;;  %v946_v16 = vmul.f32 1.442695, %v919_v7 }
 0x2bd   : > { %2051 = vpow2.f32 %v940_v4  ;;  %v942_v8 = vmul.f32 1.442695, %v917_v5  ;;  %v1940_v9 = vpop.f32.mrb[28].mxu0  ;;  %v894_v4 = vld [vmem:[%s2377_s21 + $0x10] sm:$0xff] }
 0x2be   : > { %v2298_v11 = vadd.f32 %v1940_v9, %v2244_v22  ;;  %v877_v12 = vpop.f32.mrb[29].mxu0  ;;  %2053 = vpow2.f32 %v944_v6  ;;  %1963 = vmatpush3.bf16.msra.mxu0 %v2030_v61 }
 0x2bf   : > { %v2044_v13 = vpop.eup %2043  ;;  %v2301_v14 = vadd.f32 %v877_v12, %v2244_v22  ;;  %v1941_v15 = vpop.f32.mrb[30].mxu0  ;;  %2055 = vpow2.f32 %v942_v8  ;;  %v895_v8 = vld [vmem:[%s2377_s21 + $0x18] sm:$0xff] }
 0x2c0   : > { %v922_v17 = vmul.f32 0.5, %v2298_v11  ;;  %v880_v18 = vpop.f32.mrb[31].mxu0  ;;  %980 = vrot.lane.b32.xlu0 %v2044_v13, %s2077_s23  ;;  %978 = vrot.lane.b32.xlu1 %v2042_v10, %s2077_s23  ;;  %v2308_v20 = vadd.f32 %v1941_v15, %v2244_v22  ;;  %v2046_v23 = vpop.eup %2045  ;;  %2057 = vpow2.f32 %v946_v16  ;;  %v896_v13 = vld [vmem:[%s2377_s21 + $0x20] sm:$0xff] }
 0x2c1   : > { %v920_v19 = vmul.f32 0.5, %v2301_v14  ;;  %v2311_v21 = vadd.f32 %v880_v18, %v2244_v22  ;;  %v2048_v25 = vpop.eup %2047  ;;  %v1062_v22 = vlaneseq }
 0x2c2   : > { %v952_v30 = vmul.f32 1.442695, %v922_v17  ;;  %v923_v31 = vmul.f32 0.5, %v2308_v20  ;;  %v2050_v35 = vpop.eup %2049 }
 0x2c3   : > { %v948_v27 = vmul.f32 1.442695, %v920_v19  ;;  %v921_v28 = vmul.f32 0.5, %v2311_v21  ;;  %v1063_v41 = vshrl.u32 %v1062_v22, 7  ;;  %v897_v19 = vld [vmem:[%s2377_s21 + $0x28] sm:$0xff] }
 0x2c4   : > { %984 = vrot.lane.b32.xlu0 %v2046_v23, %s2077_s23  ;;  %982 = vrot.lane.b32.xlu1 %v2048_v25, %s2077_s23  ;;  %v954_v37 = vmul.f32 1.442695, %v923_v31 }
 0x2c5   : > { %2059 = vpow2.f32 %v948_v27  ;;  %v950_v34 = vmul.f32 1.442695, %v921_v28  ;;  %v1064_v45 = vsub.s32 0, %v1063_v41  ;;  %v1068_v51 = vsub.s32 1, %v1063_v41  ;;  %v901_v41 = vld [vmem:[%s2377_s21 + $0x48] sm:$0xff] }
 0x2c6   : > { %2061 = vpow2.f32 %v952_v30 }
 0x2c7   : > { %v2052_v36 = vpop.eup %2051  ;;  %2063 = vpow2.f32 %v950_v34  ;;  %v1065_v50 = vrot.slane %v360_v46, %v1064_v45  ;;  %v1069_v53 = vrot.slane %v360_v46, %v1068_v51  ;;  %v1412_v57 = vrot.slane %v362_v55, %v1068_v51  ;;  %v899_v34 = vld [vmem:[%s2377_s21 + $0x38] sm:$0xff] }
 0x2c8   : > { %988 = vrot.lane.b32.xlu0 %v2052_v36, %s2077_s23  ;;  %986 = vrot.lane.b32.xlu1 %v2050_v35, %s2077_s23  ;;  %v2054_v38 = vpop.eup %2053  ;;  %2065 = vpow2.f32 %v954_v37  ;;  %v1408_v58 = vrot.slane %v362_v55, %v1064_v45 }
 0x2c9   : > { %v2056_v39 = vpop.eup %2055 }
 0x2ca   : > { %v2058_v43 = vpop.eup %2057 }
 0x2cc   : > { %992 = vrot.lane.b32.xlu0 %v2054_v38, %s2077_s23  ;;  %990 = vrot.lane.b32.xlu1 %v2056_v39, %s2077_s23 }
 0x2cf   : > { %v2060_v44 = vpop.eup %2059 }
 0x2d0   : > { %996 = vrot.lane.b32.xlu0 %v2060_v44, %s2077_s23  ;;  %994 = vrot.lane.b32.xlu1 %v2058_v43, %s2077_s23  ;;  %v2062_v47 = vpop.eup %2061 }
 0x2d1   : > { %v2064_v49 = vpop.eup %2063 }
 0x2d2   : > { %v2066_v52 = vpop.eup %2065 }
 0x2d4   : > { %1000 = vrot.lane.b32.xlu0 %v2062_v47, %s2077_s23  ;;  %998 = vrot.lane.b32.xlu1 %v2064_v49, %s2077_s23 }
 0x2d8   : > { %1070 = vrot.lane.b32.xlu0 %v1065_v50, %s2078_s26  ;;  %1002 = vrot.lane.b32.xlu1 %v2066_v52, %s2077_s23  ;;  %v903_v50 = vld [vmem:[%s2377_s21 + $0x58] sm:$0xff] }
 0x2dc   : > { %1248 = vrot.lane.b32.xlu0 %v1784_v54, %s2079_s11  ;;  %1072 = vrot.lane.b32.xlu1 %v1069_v53, %s2078_s26  ;;  %s2453_s11 = scalar_lea.vmem %s2531_s9, %s2151_s20 }
 0x2e0   : > { %1439 = vrot.lane.b32.xlu0 %v1412_v57, %s2080_s12  ;;  %1437 = vrot.lane.b32.xlu1 %v1408_v58, %s2080_s12  ;;  %v905_v58 = vld [vmem:[%s2377_s21 + $0x68] sm:$0xff] }
 0x2e4   : > { %1583 = vrot.lane.b32.xlu0 %v2258_v33, %s2075_s18  ;;  %1581 = vrot.lane.b32.xlu1 %v2250_v26, %s2075_s18 }
 0x2e8   : > { %1587 = vrot.lane.b32.xlu0 %v2254_v29, %s2075_s18  ;;  %1585 = vrot.lane.b32.xlu1 %v2247_v24, %s2075_s18 }
 0x2ec   : > { %1591 = vrot.lane.b32.xlu0 %v2274_v48, %s2075_s18  ;;  %1589 = vrot.lane.b32.xlu1 %v2266_v42, %s2075_s18 }
 0x2f0   : > { %1595 = vrot.lane.b32.xlu0 %v2270_v32, %s2075_s18  ;;  %1593 = vrot.lane.b32.xlu1 %v2263_v40, %s2075_s18 }
 0x2f4   : > { %1599 = vrot.lane.b32.xlu0 %v2292_v2, %s2075_s18  ;;  %1597 = vrot.lane.b32.xlu1 %v2282_v59, %s2075_s18 }
 0x2f8   : > { %1603 = vrot.lane.b32.xlu0 %v2287_v63, %s2075_s18  ;;  %1601 = vrot.lane.b32.xlu1 %v2279_v56, %s2075_s18 }
 0x2fc   : > { %1607 = vrot.lane.b32.xlu0 %v2311_v21, %s2075_s18  ;;  %1605 = vrot.lane.b32.xlu1 %v2301_v14, %s2075_s18 }
 0x300   : > { %1611 = vrot.lane.b32.xlu0 %v2308_v20, %s2075_s18  ;;  %1609 = vrot.lane.b32.xlu1 %v2298_v11, %s2075_s18 }
 0x329   : > { %v977_v5 = vpop.permute.xlu0 %976 }
 0x32a   : > { %v973_v0 = vpop.permute.xlu1 %972  ;;  %v1022_v9 = vmul.f32 %v977_v5, %v894_v4  ;;  %v907_v4 = vld [vmem:[%s2377_s21 + $0x78] sm:$0xff] }
 0x32b   : > { %v1020_v3 = vmul.f32 %v973_v0, %v892_v62 }
 0x32c   : > { %v1038_v23 = vadd.f32 %v1022_v9, %v2247_v24  ;;  %v900_v24 = vld [vmem:[%s2377_s21 + $0x40] sm:$0xff] }
 0x32d   : > { %v1036_v10 = vadd.f32 %v1020_v3, %v2250_v26  ;;  %v898_v26 = vld [vmem:[%s2377_s21 + $0x30] sm:$0xff] }
 0x32e   : > { %v975_v6 = vpop.permute.xlu1 %974 }
 0x32f   : > { %v1021_v7 = vmul.f32 %v975_v6, %v893_v1 }
 0x331   : > { %v1037_v12 = vadd.f32 %v1021_v7, %v2258_v33 }
 0x332   : > { %v981_v15 = vpop.permute.xlu0 %980  ;;  %v979_v16 = vpop.permute.xlu1 %978 }
 0x333   : > { %v1052_v17 = vpack.c.bf16 %v1037_v12, %v1036_v10  ;;  %v1023_v18 = vmul.f32 %v979_v16, %v895_v8  ;;  %v1024_v25 = vmul.f32 %v981_v15, %v896_v13 }
 0x335   : > { %v1039_v27 = vadd.f32 %v1023_v18, %v2254_v29  ;;  %1944 = vmatprep.mubr.msk.bf16.mxu1 %vm1077_vm3, %v1052_v17  ;;  %v1040_v35 = vadd.f32 %v1024_v25, %v2266_v42  ;;  %v902_v42 = vld [vmem:[%s2377_s21 + $0x50] sm:$0xff] }
 0x336   : > { %v985_v28 = vpop.permute.xlu0 %984  ;;  %v983_v33 = vpop.permute.xlu1 %982 }
 0x337   : > { %v1053_v30 = vpack.c.bf16 %v1039_v27, %v1038_v23  ;;  %v1025_v31 = vmul.f32 %v983_v33, %v897_v19  ;;  %v1026_v36 = vmul.f32 %v985_v28, %v898_v26 }
 0x339   : > { %v1041_v22 = vadd.f32 %v1025_v31, %v2274_v48  ;;  %1945 = vmatmul.mubr.msk.bf16.vlgmr.msra.gmra.mrb[16].mxu1 %vm1077_vm3, %v1053_v30  ;;  %v1042_v43 = vadd.f32 %v1026_v36, %v2263_v40  ;;  %v904_v40 = vld [vmem:[%s2377_s21 + $0x60] sm:$0xff] }
 0x33a   : > { %v989_v29 = vpop.permute.xlu0 %988  ;;  %v987_v37 = vpop.permute.xlu1 %986 }
 0x33b   : > { %v1054_v38 = vpack.c.bf16 %v1041_v22, %v1040_v35  ;;  %v1027_v39 = vmul.f32 %v987_v37, %v899_v34  ;;  %v1028_v44 = vmul.f32 %v989_v29, %v900_v24 }
 0x33d   : > { %v1043_v45 = vadd.f32 %v1027_v39, %v2270_v32  ;;  %1948 = vmatprep.mubr.msk.bf16.mxu1 %vm1077_vm3, %v1054_v38  ;;  %v1044_v51 = vadd.f32 %v1028_v44, %v2282_v59  ;;  %v906_v59 = vld [vmem:[%s2377_s21 + $0x70] sm:$0xff] }
 0x33e   : > { %v993_v48 = vpop.permute.xlu0 %992  ;;  %v991_v46 = vpop.permute.xlu1 %990 }
 0x33f   : > { %v1055_v47 = vpack.c.bf16 %v1043_v45, %v1042_v43  ;;  %v1029_v49 = vmul.f32 %v991_v46, %v901_v41  ;;  %v1030_v52 = vmul.f32 %v993_v48, %v902_v42 }
 0x341   : > { %v1045_v53 = vadd.f32 %v1029_v49, %v2292_v2  ;;  %1949 = vmatmul.mubr.msk.bf16.gmra.mrb[20].mxu1 %vm1077_vm3, %v1055_v47  ;;  %v1046_v60 = vadd.f32 %v1030_v52, %v2279_v56 }
 0x342   : > { %v997_v32 = vpop.permute.xlu0 %996  ;;  %v995_v54 = vpop.permute.xlu1 %994 }
 0x343   : > { %v1056_v55 = vpack.c.bf16 %v1045_v53, %v1044_v51  ;;  %v1031_v57 = vmul.f32 %v995_v54, %v903_v50  ;;  %v1032_v61 = vmul.f32 %v997_v32, %v904_v40 }
 0x345   : > { %v1047_v62 = vadd.f32 %v1031_v57, %v2287_v63  ;;  %1952 = vmatprep.mubr.msk.bf16.mxu1 %vm1077_vm3, %v1056_v55  ;;  %v1048_v5 = vadd.f32 %v1032_v61, %v2301_v14  ;;  %v2031_v14 = vld [vmem:[%s2529_s7] sm:$0xff]  }
 0x346   : > { %v1001_v0 = vpop.permute.xlu0 %1000  ;;  %v999_v1 = vpop.permute.xlu1 %998  ;;  %1980 = vmatprep.subr.bf16.mxu1 %v2031_v14 }
 0x347   : > { %v1057_v2 = vpack.c.bf16 %v1047_v62, %v1046_v60  ;;  %v1033_v3 = vmul.f32 %v999_v1, %v905_v58  ;;  %v1034_v6 = vmul.f32 %v1001_v0, %v906_v59  ;;  %1981 = vmatpush3.bf16.msra.mxu1 %v2031_v14 }
 0x349   : > { %v1049_v7 = vadd.f32 %v1033_v3, %v2311_v21  ;;  %1953 = vmatmul.mubr.msk.bf16.gmra.mrb[24].mxu1 %vm1077_vm3, %v1057_v2  ;;  %v1050_v63 = vadd.f32 %v1034_v6, %v2298_v11  ;;  %v2032_v21 = vld [vmem:[%s2529_s7 + $0x8] sm:$0xff]   ;;  %v2033_v11 = vld [vmem:[%s2529_s7 + $0x10] sm:$0xff]  }
 0x34a   : > { %v1003_v8 = vpop.permute.xlu1 %1002  ;;  %1982 = vmatprep.subr.bf16.mxu1 %v2032_v21 }
 0x34b   : > { %v1058_v56 = vpack.c.bf16 %v1049_v7, %v1048_v5  ;;  %v1035_v9 = vmul.f32 %v1003_v8, %v907_v4  ;;  %1983 = vmatpush3.bf16.msra.mxu1 %v2032_v21 }
 0x34c   : > { %1984 = vmatprep.subr.bf16.mxu1 %v2033_v11 }
 0x34d   : > { %v1051_v10 = vadd.f32 %v1035_v9, %v2308_v20  ;;  %1956 = vmatprep.mubr.msk.bf16.mxu1 %vm1077_vm3, %v1058_v56  ;;  %v1071_v20 = vpop.permute.xlu0 %1070 }
 0x34e   : > { %v1073_v13 = vpop.permute.xlu1 %1072 }
 0x34f   : > { %v1059_v12 = vpack.c.bf16 %v1051_v10, %v1050_v63  ;;  %1985 = vmatpush3.bf16.msra.mxu1 %v2033_v11  ;;  %v1075_v15 = vsel %vm1074_vm4, %v1071_v20, %v1073_v13  ;;  %v2034_v10 = vld [vmem:[%s2529_s7 + $0x18] sm:$0xff]  }
 0x350   : > { %1986 = vmatprep.subr.bf16.mxu1 %v2034_v10 }
 0x351   : > { %1957 = vmatmul.mubr.msk.bf16.gmra.mrb[28].mxu1 %vm1077_vm3, %v1059_v12  ;;  %v1249_v12 = vpop.permute.xlu0 %1248 }
 0x353   : > { %1987 = vmatpush3.bf16.msra.mxu1 %v2034_v10 }
 0x40c   : > { %v1946_v16 = vpop.f32.mrb[16].mxu1 }
 0x40d   : > { %v1149_v17 = vadd.f32 %v1946_v16, %v1075_v15  ;;  %v1140_v18 = vpop.f32.mrb[17].mxu1 }
 0x40e   : > { %v1141_v19 = vadd.f32 %v1140_v18, %v1075_v15  ;;  %v1947_v23 = vpop.f32.mrb[18].mxu1 }
 0x40f   : > { %v1152_v25 = vadd.f32 %v1947_v23, %v1075_v15  ;;  %v1143_v27 = vpop.f32.mrb[19].mxu1  ;;  %v1205_v28 = vmax.f32 %v1149_v17, 0.0 }
 0x410   : > { %v1144_v26 = vadd.f32 %v1143_v27, %v1075_v15  ;;  %v1203_v30 = vmax.f32 %v1141_v19, 0.0 }
 0x411   : > { %v1206_v33 = vmax.f32 %v1152_v25, 0.0 }
 0x412   : > { %v1204_v31 = vmax.f32 %v1144_v26, 0.0 }
 0x413   : > { %v1220_v34 = vpack.c.bf16 %v1206_v33, %v1205_v28 }
 0x414   : > { %v1219_v35 = vpack.c.bf16 %v1204_v31, %v1203_v30  ;;  %v1950_v36 = vpop.f32.mrb[20].mxu1 }
 0x415   : > { %v1165_v22 = vadd.f32 %v1950_v36, %v1075_v15  ;;  %v1156_v24 = vpop.f32.mrb[21].mxu1 }
 0x416   : > { %v1157_v29 = vadd.f32 %v1156_v24, %v1075_v15  ;;  %v1951_v37 = vpop.f32.mrb[22].mxu1  ;;  %1964 = vmatprep.mubr.msk.bf16.mxu0 %vm770_vm1, %v1219_v35 }
 0x417   : > { %v1168_v38 = vadd.f32 %v1951_v37, %v1075_v15  ;;  %v1159_v39 = vpop.f32.mrb[23].mxu1  ;;  %1965 = vmatmul.mubr.msk.bf16.vlgmr.msra.gmra.mrb[32].mxu0 %vm770_vm1, %v1220_v34  ;;  %v1209_v43 = vmax.f32 %v1165_v22, 0.0 }
 0x418   : > { %v1160_v41 = vadd.f32 %v1159_v39, %v1075_v15  ;;  %v1207_v45 = vmax.f32 %v1157_v29, 0.0 }
 0x419   : > { %v1210_v44 = vmax.f32 %v1168_v38, 0.0 }
 0x41a   : > { %v1208_v42 = vmax.f32 %v1160_v41, 0.0 }
 0x41b   : > { %v1222_v48 = vpack.c.bf16 %v1210_v44, %v1209_v43 }
 0x41c   : > { %v1221_v46 = vpack.c.bf16 %v1208_v42, %v1207_v45  ;;  %v1954_v47 = vpop.f32.mrb[24].mxu1 }
 0x41d   : > { %v1181_v49 = vadd.f32 %v1954_v47, %v1075_v15  ;;  %v1172_v50 = vpop.f32.mrb[25].mxu1 }
 0x41e   : > { %v1173_v51 = vadd.f32 %v1172_v50, %v1075_v15  ;;  %v1955_v52 = vpop.f32.mrb[26].mxu1  ;;  %1968 = vmatprep.mubr.msk.bf16.mxu0 %vm770_vm1, %v1221_v46 }
 0x41f   : > { %v1184_v53 = vadd.f32 %v1955_v52, %v1075_v15  ;;  %v1175_v40 = vpop.f32.mrb[27].mxu1  ;;  %1969 = vmatmul.mubr.msk.bf16.gmra.mrb[36].mxu0 %vm770_vm1, %v1222_v48  ;;  %v1213_v54 = vmax.f32 %v1181_v49, 0.0 }
 0x420   : > { %v1176_v32 = vadd.f32 %v1175_v40, %v1075_v15  ;;  %v1211_v57 = vmax.f32 %v1173_v51, 0.0 }
 0x421   : > { %v1214_v55 = vmax.f32 %v1184_v53, 0.0 }
 0x422   : > { %v1212_v58 = vmax.f32 %v1176_v32, 0.0 }
 0x423   : > { %v1224_v60 = vpack.c.bf16 %v1214_v55, %v1213_v54 }
 0x424   : > { %v1223_v61 = vpack.c.bf16 %v1212_v58, %v1211_v57  ;;  %v1958_v62 = vpop.f32.mrb[28].mxu1 }
 0x425   : > { %v1197_v59 = vadd.f32 %v1958_v62, %v1075_v15  ;;  %v1188_v0 = vpop.f32.mrb[29].mxu1 }
 0x426   : > { %v1189_v1 = vadd.f32 %v1188_v0, %v1075_v15  ;;  %v1959_v2 = vpop.f32.mrb[30].mxu1  ;;  %1972 = vmatprep.mubr.msk.bf16.mxu0 %vm770_vm1, %v1223_v61 }
 0x427   : > { %v1200_v3 = vadd.f32 %v1959_v2, %v1075_v15  ;;  %v1191_v4 = vpop.f32.mrb[31].mxu1  ;;  %1973 = vmatmul.mubr.msk.bf16.gmra.mrb[40].mxu0 %vm770_vm1, %v1224_v60  ;;  %v1217_v6 = vmax.f32 %v1197_v59, 0.0 }
 0x428   : > { %v1192_v5 = vadd.f32 %v1191_v4, %v1075_v15  ;;  %v1215_v8 = vmax.f32 %v1189_v1, 0.0 }
 0x429   : > { %v1218_v7 = vmax.f32 %v1200_v3, 0.0 }
 0x42a   : > { %v1216_v56 = vmax.f32 %v1192_v5, 0.0 }
 0x42b   : > { %v1226_v9 = vpack.c.bf16 %v1218_v7, %v1217_v6  ;;  %v1438_v6 = vpop.permute.xlu1 %1437  ;;  %v1440_v7 = vpop.permute.xlu0 %1439 }
 0x42c   : > { %v1225_v63 = vpack.c.bf16 %v1216_v56, %v1215_v8 }
 0x42e   : > { %1976 = vmatprep.mubr.msk.bf16.mxu0 %vm770_vm1, %v1225_v63 }
 0x42f   : > { %1977 = vmatmul.mubr.msk.bf16.gmra.mrb[44].mxu0 %vm770_vm1, %v1226_v9  ;;  %v1582_v8 = vpop.permute.xlu1 %1581  ;;  %v1584_v56 = vpop.permute.xlu0 %1583 }
 0x433   : > { %v1586_v9 = vpop.permute.xlu1 %1585  ;;  %v1588_v63 = vpop.permute.xlu0 %1587 }
 0x437   : > { %v1590_v10 = vpop.permute.xlu1 %1589 }
 0x4ea   : > { %v1966_v14 = vpop.f32.mrb[32].mxu0 }
 0x4eb   : > { %v1318_v21 = vadd.f32 %v1966_v14, %v1249_v12  ;;  %v1309_v11 = vpop.f32.mrb[33].mxu0  ;;  %v2447_v14 = vsel %vm1441_vm5, %v1438_v6, %v1440_v7 }
 0x4ec   : > { %v1310_v20 = vadd.f32 %v1309_v11, %v1249_v12  ;;  %v1967_v13 = vpop.f32.mrb[34].mxu0 }
 0x4ed   : > { %v1321_v15 = vadd.f32 %v1967_v13, %v1249_v12  ;;  %v1312_v16 = vpop.f32.mrb[35].mxu0  ;;  %v1374_v18 = vmax.f32 %v1318_v21, 0.0  ;;  %v1594_v13 = vpop.permute.xlu1 %1593 }
 0x4ee   : > { %v1313_v17 = vadd.f32 %v1312_v16, %v1249_v12  ;;  %v1372_v23 = vmax.f32 %v1310_v20, 0.0 }
 0x4ef   : > { %v1375_v19 = vmax.f32 %v1321_v15, 0.0 }
 0x4f0   : > { %v1373_v25 = vmax.f32 %v1313_v17, 0.0 }
 0x4f1   : > { %v1389_v27 = vpack.c.bf16 %v1375_v19, %v1374_v18 }
 0x4f2   : > { %v1388_v26 = vpack.c.bf16 %v1373_v25, %v1372_v23  ;;  %v1970_v28 = vpop.f32.mrb[36].mxu0 }
 0x4f3   : > { %v1334_v33 = vadd.f32 %v1970_v28, %v1249_v12  ;;  %v1325_v30 = vpop.f32.mrb[37].mxu0 }
 0x4f4   : > { %v1326_v31 = vadd.f32 %v1325_v30, %v1249_v12  ;;  %v1971_v34 = vpop.f32.mrb[38].mxu0  ;;  %1988 = vmatprep.mubr.msk.bf16.mxu1 %vm425_vm0, %v1388_v26 }
 0x4f5   : > { %v1337_v35 = vadd.f32 %v1971_v34, %v1249_v12  ;;  %v1328_v36 = vpop.f32.mrb[39].mxu0  ;;  %1989 = vmatmul.mubr.msk.bf16.vlgmr.msra.gmra.mrb[32].mxu1 %vm425_vm0, %v1389_v27  ;;  %v1378_v24 = vmax.f32 %v1334_v33, 0.0  ;;  %v1598_v33 = vpop.permute.xlu1 %1597 }
 0x4f6   : > { %v1329_v22 = vadd.f32 %v1328_v36, %v1249_v12  ;;  %v1376_v37 = vmax.f32 %v1326_v31, 0.0 }
 0x4f7   : > { %v1379_v29 = vmax.f32 %v1337_v35, 0.0 }
 0x4f8   : > { %v1377_v38 = vmax.f32 %v1329_v22, 0.0 }
 0x4f9   : > { %v1391_v39 = vpack.c.bf16 %v1379_v29, %v1378_v24 }
 0x4fa   : > { %v1390_v41 = vpack.c.bf16 %v1377_v38, %v1376_v37  ;;  %v1974_v43 = vpop.f32.mrb[40].mxu0 }
 0x4fb   : > { %v1350_v44 = vadd.f32 %v1974_v43, %v1249_v12  ;;  %v1341_v45 = vpop.f32.mrb[41].mxu0  ;;  %v1602_v43 = vpop.permute.xlu1 %1601 }
 0x4fc   : > { %v1342_v42 = vadd.f32 %v1341_v45, %v1249_v12  ;;  %v1975_v48 = vpop.f32.mrb[42].mxu0  ;;  %1992 = vmatprep.mubr.msk.bf16.mxu1 %vm425_vm0, %v1390_v41 }
 0x4fd   : > { %v1353_v46 = vadd.f32 %v1975_v48, %v1249_v12  ;;  %v1344_v47 = vpop.f32.mrb[43].mxu0  ;;  %1993 = vmatmul.mubr.msk.bf16.gmra.mrb[36].mxu1 %vm425_vm0, %v1391_v39  ;;  %v1382_v50 = vmax.f32 %v1350_v44, 0.0 }
 0x4fe   : > { %v1345_v49 = vadd.f32 %v1344_v47, %v1249_v12  ;;  %v1380_v52 = vmax.f32 %v1342_v42, 0.0 }
 0x4ff   : > { %v1383_v51 = vmax.f32 %v1353_v46, 0.0 }
 0x500   : > { %v1381_v53 = vmax.f32 %v1345_v49, 0.0 }
 0x501   : > { %v1393_v40 = vpack.c.bf16 %v1383_v51, %v1382_v50 }
 0x502   : > { %v1392_v32 = vpack.c.bf16 %v1381_v53, %v1380_v52  ;;  %v1978_v54 = vpop.f32.mrb[44].mxu0  ;;  %v1606_v53 = vpop.permute.xlu1 %1605 }
 0x503   : > { %v1366_v55 = vadd.f32 %v1978_v54, %v1249_v12  ;;  %v1357_v57 = vpop.f32.mrb[45].mxu0 }
 0x504   : > { %v1358_v58 = vadd.f32 %v1357_v57, %v1249_v12  ;;  %v1979_v60 = vpop.f32.mrb[46].mxu0  ;;  %1996 = vmatprep.mubr.msk.bf16.mxu1 %vm425_vm0, %v1392_v32 }
 0x505   : > { %v1369_v61 = vadd.f32 %v1979_v60, %v1249_v12  ;;  %v1360_v62 = vpop.f32.mrb[47].mxu0  ;;  %1997 = vmatmul.mubr.msk.bf16.gmra.mrb[40].mxu1 %vm425_vm0, %v1393_v40  ;;  %v1386_v0 = vmax.f32 %v1366_v55, 0.0 }
 0x506   : > { %v1361_v59 = vadd.f32 %v1360_v62, %v1249_v12  ;;  %v1384_v2 = vmax.f32 %v1358_v58, 0.0  ;;  %v1592_v12 = vpop.permute.xlu0 %1591  ;;  %v1610_v62 = vpop.permute.xlu1 %1609 }
 0x507   : > { %v1387_v1 = vmax.f32 %v1369_v61, 0.0 }
 0x508   : > { %v1385_v3 = vmax.f32 %v1361_v59, 0.0 }
 0x509   : > { %v1395_v4 = vpack.c.bf16 %v1387_v1, %v1386_v0 }
 0x50a   : > { %v1394_v5 = vpack.c.bf16 %v1385_v3, %v1384_v2  ;;  %v1596_v23 = vpop.permute.xlu0 %1595 }
 0x50c   : > { %2000 = vmatprep.mubr.msk.bf16.mxu1 %vm425_vm0, %v1394_v5 }
 0x50d   : > { %2001 = vmatmul.mubr.msk.bf16.gmra.mrb[44].mxu1 %vm425_vm0, %v1395_v4 }
 0x50e   : > { %v1600_v35 = vpop.permute.xlu0 %1599 }
 0x512   : > { %v1604_v45 = vpop.permute.xlu0 %1603 }
 0x516   : > { %v1608_v55 = vpop.permute.xlu0 %1607 }
 0x51a   : > { %v1612_v4 = vpop.permute.xlu0 %1611 }
 0x5c8   : > { %v1990_v21 = vpop.f32.mrb[32].mxu1 }
 0x5c9   : > { %v1511_v11 = vadd.f32 %v1990_v21, %v2447_v14  ;;  %v1502_v20 = vpop.f32.mrb[33].mxu1 }
 0x5ca   : > { %v1503_v15 = vadd.f32 %v1502_v20, %v2447_v14  ;;  %v1991_v16 = vpop.f32.mrb[34].mxu1 }
 0x5cb   : > { %v1631_v17 = vsel %vm425_vm0, %v1511_v11, %v1586_v9  ;;  %v1514_v18 = vadd.f32 %v1991_v16, %v2447_v14  ;;  %v1505_v19 = vpop.f32.mrb[35].mxu1 }
 0x5cc   : > { %1648 = vst.msk [vmem:[%s2453_s11 + $0x10] sm:$0xff] %vm1645_vm6, %v1631_v17  ;;  %v1629_v25 = vsel %vm425_vm0, %v1503_v15, %v1582_v8  ;;  %v1506_v27 = vadd.f32 %v1505_v19, %v2447_v14 }
 0x5cd   : > { %1646 = vst.msk [vmem:[%s2453_s11] sm:$0xff] %vm1645_vm6, %v1629_v25  ;;  %v1632_v26 = vsel %vm425_vm0, %v1514_v18, %v1588_v63 }
 0x5ce   : > { %1649 = vst.msk [vmem:[%s2453_s11 + $0x18] sm:$0xff] %vm1645_vm6, %v1632_v26  ;;  %v1630_v28 = vsel %vm425_vm0, %v1506_v27, %v1584_v56 }
 0x5cf   : > { %1647 = vst.msk [vmem:[%s2453_s11 + $0x8] sm:$0xff] %vm1645_vm6, %v1630_v28 }
 0x5d0   : > { %v1994_v30 = vpop.f32.mrb[36].mxu1 }
 0x5d1   : > { %v1527_v31 = vadd.f32 %v1994_v30, %v2447_v14  ;;  %v1518_v34 = vpop.f32.mrb[37].mxu1 }
 0x5d2   : > { %v1519_v36 = vadd.f32 %v1518_v34, %v2447_v14  ;;  %v1995_v22 = vpop.f32.mrb[38].mxu1 }
 0x5d3   : > { %v1635_v24 = vsel %vm425_vm0, %v1527_v31, %v1594_v13  ;;  %v1530_v29 = vadd.f32 %v1995_v22, %v2447_v14  ;;  %v1521_v37 = vpop.f32.mrb[39].mxu1 }
 0x5d4   : > { %1652 = vst.msk [vmem:[%s2453_s11 + $0x30] sm:$0xff] %vm1645_vm6, %v1635_v24  ;;  %v1633_v38 = vsel %vm425_vm0, %v1519_v36, %v1590_v10  ;;  %v1522_v39 = vadd.f32 %v1521_v37, %v2447_v14 }
 0x5d5   : > { %1650 = vst.msk [vmem:[%s2453_s11 + $0x20] sm:$0xff] %vm1645_vm6, %v1633_v38  ;;  %v1636_v41 = vsel %vm425_vm0, %v1530_v29, %v1596_v23 }
 0x5d6   : > { %1653 = vst.msk [vmem:[%s2453_s11 + $0x38] sm:$0xff] %vm1645_vm6, %v1636_v41  ;;  %v1634_v44 = vsel %vm425_vm0, %v1522_v39, %v1592_v12 }
 0x5d7   : > { %1651 = vst.msk [vmem:[%s2453_s11 + $0x28] sm:$0xff] %vm1645_vm6, %v1634_v44 }
 0x5d8   : > { %v1998_v42 = vpop.f32.mrb[40].mxu1 }
 0x5d9   : > { %v1543_v48 = vadd.f32 %v1998_v42, %v2447_v14  ;;  %v1534_v46 = vpop.f32.mrb[41].mxu1 }
 0x5da   : > { %v1535_v47 = vadd.f32 %v1534_v46, %v2447_v14  ;;  %v1999_v49 = vpop.f32.mrb[42].mxu1 }
 0x5db   : > { %v1639_v50 = vsel %vm425_vm0, %v1543_v48, %v1602_v43  ;;  %v1546_v51 = vadd.f32 %v1999_v49, %v2447_v14  ;;  %v1537_v52 = vpop.f32.mrb[43].mxu1 }
 0x5dc   : > { %1656 = vst.msk [vmem:[%s2453_s11 + $0x50] sm:$0xff] %vm1645_vm6, %v1639_v50  ;;  %v1637_v40 = vsel %vm425_vm0, %v1535_v47, %v1598_v33  ;;  %v1538_v32 = vadd.f32 %v1537_v52, %v2447_v14 }
 0x5dd   : > { %1654 = vst.msk [vmem:[%s2453_s11 + $0x40] sm:$0xff] %vm1645_vm6, %v1637_v40  ;;  %v1640_v54 = vsel %vm425_vm0, %v1546_v51, %v1604_v45 }
 0x5de   : > { %1657 = vst.msk [vmem:[%s2453_s11 + $0x58] sm:$0xff] %vm1645_vm6, %v1640_v54  ;;  %v1638_v57 = vsel %vm425_vm0, %v1538_v32, %v1600_v35 }
 0x5df   : > { %1655 = vst.msk [vmem:[%s2453_s11 + $0x48] sm:$0xff] %vm1645_vm6, %v1638_v57 }
 0x5e0   : > { %v2002_v58 = vpop.f32.mrb[44].mxu1 }
 0x5e1   : > { %v1559_v60 = vadd.f32 %v2002_v58, %v2447_v14  ;;  %v1550_v61 = vpop.f32.mrb[45].mxu1 }
 0x5e2   : > { %v1551_v59 = vadd.f32 %v1550_v61, %v2447_v14  ;;  %v2003_v0 = vpop.f32.mrb[46].mxu1 }
 0x5e3   : > { %v1643_v1 = vsel %vm425_vm0, %v1559_v60, %v1610_v62  ;;  %v1562_v2 = vadd.f32 %v2003_v0, %v2447_v14  ;;  %v1553_v3 = vpop.f32.mrb[47].mxu1 }
 0x5e4   : > { %1660 = vst.msk [vmem:[%s2453_s11 + $0x70] sm:$0xff] %vm1645_vm6, %v1643_v1  ;;  %v1641_v5 = vsel %vm425_vm0, %v1551_v59, %v1606_v53  ;;  %v1554_v6 = vadd.f32 %v1553_v3, %v2447_v14 }
 0x5e5   : > { %1658 = vst.msk [vmem:[%s2453_s11 + $0x60] sm:$0xff] %vm1645_vm6, %v1641_v5  ;;  %v1644_v7 = vsel %vm425_vm0, %v1562_v2, %v1612_v4 }
 0x5e6   : > { %1661 = vst.msk [vmem:[%s2453_s11 + $0x78] sm:$0xff] %vm1645_vm6, %v1644_v7  ;;  %v1642_v8 = vsel %vm425_vm0, %v1554_v6, %v1608_v55 }
 0x5e7   : > { %1659 = vst.msk [vmem:[%s2453_s11 + $0x68] sm:$0xff] %vm1645_vm6, %v1642_v8 }
 0x5e8 PF: > { %s19_s30 = sadd.s32 1, %s2073_s30  }
 0x5e9   : > { %p16_p4 = scmp.ge.s32.totalorder %s19_s30, 4  }
 0x5eb   :  { %18 = sbr.rel (!%p16_p4) target bundleno = 1 (0x1), region = 89 }

</bundles_post_ra>
